<compile_context>
chip_gen: v7x
topology: tpu7x:2x2x1
jax: 0.10.0
libtpu: 0.0.40
codegen_flags: <defaults>
</compile_context>

<pallas_src>
import jax
import jax.numpy as jnp
from jax.experimental import pallas as pl
from jax.experimental.pallas import tpu as pltpu


def _embed_kernel(x_ref, scale_ref, shift_ref, w1_ref, w2_ref, o_ref):
    # x_ref:     (NB, C, VT)  channel-major block, lane dim = V*T (lane dense)
    # scale_ref: (C, VT)      folded BN scale (gamma / sqrt(var+eps)), T-expanded
    # shift_ref: (C, VT)      folded BN shift (beta - mean*scale), T-expanded
    # w1_ref:    (H, C)       first 1x1 conv weight (Cout, Cin)
    # w2_ref:    (D1, H)      second 1x1 conv weight (Cout, Cin)
    # o_ref:     (NB, D1, VT)
    scale = scale_ref[...]
    shift = shift_ref[...]
    w1 = w1_ref[...]
    w2 = w2_ref[...]
    C = w1.shape[1]
    nb = x_ref.shape[0]
    for b in range(nb):                        # nb is a small static constant
        xn = x_ref[b] * scale + shift          # norm_data (BN, eval mode)
        # First conv: K = C (tiny, e.g. 3) -> C VPU broadcast-FMAs instead of
        # dragging a nearly empty weight tile through the MXU.
        h = w1[:, 0:1] * xn[0:1, :]            # (H, 1) * (1, VT) -> (H, VT)
        for c in range(1, C):
            h = h + w1[:, c:c + 1] * xn[c:c + 1, :]
        h = jnp.maximum(h, 0.0)                # ReLU
        # Second conv: K = 64 -> MXU matmul, weights on the left so the lane
        # dimension of the output stays V*T (unmasked lane-dense stores).
        o = jnp.dot(w2, h, preferred_element_type=jnp.float32)
        o = jnp.maximum(o, 0.0)                # ReLU
        o_ref[b] = o.astype(o_ref.dtype)


def _pick_nb(N, VT, target_lanes=2048):
    """Batch rows per grid step: ~target_lanes lanes of work per step to
    amortize per-step overhead, while (a) keeping >= 2 grid steps when
    possible so both v7x TensorCores get work and (b) requiring nb | N so no
    ragged tail tile is needed."""
    cap = max(1, target_lanes // max(VT, 1))
    if N >= 2:
        cap = min(cap, max(1, N // 2))
    nb = 1
    for d in range(1, min(cap, N) + 1):
        if N % d == 0:
            nb = d
    return nb


def embed_forward(x_ncvt, bn_gamma, bn_beta, bn_mean, bn_var, w1, w2,
                  *, eps=1e-5, nb=None):
    """x_ncvt: (N, C, V, T) float32.  w1: (64, C).  w2: (dim1, 64)."""
    N, C, V, T = x_ncvt.shape
    H = w1.shape[0]       # 64
    D1 = w2.shape[0]      # dim1
    VT = V * T

    # Fold BatchNorm1d(C*V) (eval mode) into per-(c, v) scale/shift.  PyTorch
    # view(N, -1, T) flattens (C, V) with channel index = c*V + v.  Expand
    # over T only -> (C, V*T) is a few KB and stays resident in VMEM.
    inv = bn_gamma / jnp.sqrt(bn_var + eps)                   # (C*V,)
    shf = bn_beta - bn_mean * inv                             # (C*V,)
    scale_cvt = jnp.broadcast_to(inv.reshape(C, V)[:, :, None],
                                 (C, V, T)).reshape(C, VT)
    shift_cvt = jnp.broadcast_to(shf.reshape(C, V)[:, :, None],
                                 (C, V, T)).reshape(C, VT)

    # Channel-major: (N, C, V, T) -> (N, C, V*T) is a free row-major reshape;
    # no input or output transposes.
    x_flat = x_ncvt.reshape(N, C, VT)

    if nb is None:
        nb = _pick_nb(N, VT)
    assert N % nb == 0
    grid = (N // nb,)

    out_flat = pl.pallas_call(
        _embed_kernel,
        out_shape=jax.ShapeDtypeStruct((N, D1, VT), x_ncvt.dtype),
        grid_spec=pltpu.PrefetchScalarGridSpec(
            num_scalar_prefetch=0,
            grid=grid,
            in_specs=[
                pl.BlockSpec((nb, C, VT), lambda i: (i, 0, 0)),   # x block
                pl.BlockSpec((C, VT), lambda i: (0, 0)),          # BN scale
                pl.BlockSpec((C, VT), lambda i: (0, 0)),          # BN shift
                pl.BlockSpec((H, C), lambda i: (0, 0)),           # w1
                pl.BlockSpec((D1, H), lambda i: (0, 0)),          # w2
            ],
            out_specs=pl.BlockSpec((nb, D1, VT), lambda i: (i, 0, 0)),
        ),
        compiler_params=pltpu.CompilerParams(
            dimension_semantics=("parallel",)),
    )(x_flat, scale_cvt, shift_cvt, w1, w2)

    # (N, D1, V*T) -> (N, D1, V, T): free reshape, already NCHW order.
    return out_flat.reshape(N, D1, V, T)


def embed_reference(x, bn_gamma, bn_beta, bn_mean, bn_var, w1, w2, eps=1e-5):
    """Pure-JAX reference matching the PyTorch forward (eval-mode BN)."""
    N, C, V, T = x.shape
    xf = x.reshape(N, C * V, T)
    xn = ((xf - bn_mean[None, :, None])
          / jnp.sqrt(bn_var + eps)[None, :, None]
          * bn_gamma[None, :, None] + bn_beta[None, :, None])
    xn = xn.reshape(N, C, V, T)
    h = jnp.maximum(jnp.einsum('oc,ncvt->novt', w1, xn), 0.0)
    o = jnp.maximum(jnp.einsum('oh,nhvt->novt', w2, h), 0.0)
    return o


if __name__ == "__main__":
    # embed(dim=3, dim1=128, norm=True, bias=False); norm_data hard-codes
    # num_joint=25, so V must be 25.
    N, C, V, T = 2, 3, 25, 8
    HID, DIM1 = 64, 128

    key = jax.random.PRNGKey(0)
    k_x, k_g, k_b, k_m, k_v, k_w1, k_w2 = jax.random.split(key, 7)

    x = jax.random.normal(k_x, (N, C, V, T), dtype=jnp.float32)

    # BatchNorm1d(C*V) parameters / running stats (deterministic, non-trivial)
    bn_gamma = 1.0 + 0.1 * jax.random.normal(k_g, (C * V,), dtype=jnp.float32)
    bn_beta = 0.1 * jax.random.normal(k_b, (C * V,), dtype=jnp.float32)
    bn_mean = 0.1 * jax.random.normal(k_m, (C * V,), dtype=jnp.float32)
    bn_var = 0.5 + jnp.abs(jax.random.normal(k_v, (C * V,), dtype=jnp.float32))

    # 1x1 conv weights (bias=False), shapes (Cout, Cin) after squeezing k=1
    w1 = 0.5 * jax.random.normal(k_w1, (HID, C), dtype=jnp.float32)
    w2 = 0.1 * jax.random.normal(k_w2, (DIM1, HID), dtype=jnp.float32)

    out = embed_forward(x, bn_gamma, bn_beta, bn_mean, bn_var, w1, w2)
    out = jax.block_until_ready(out)

    ref = embed_reference(x, bn_gamma, bn_beta, bn_mean, bn_var, w1, w2)
    assert out.shape == (N, DIM1, V, T), out.shape
    assert jnp.allclose(out, ref, rtol=1e-4, atol=1e-4), "mismatch vs reference"

    print("KERNEL_OK")
</pallas_src>

<mosaic_0001>
module attributes {stable_mosaic.version = 11 : i64} {
  func.func @_embed_kernel(%arg0: i32, %arg1: memref<1x3x200xf32, #tpu.memory_space<vmem>>, %arg2: memref<3x200xf32, #tpu.memory_space<vmem>>, %arg3: memref<3x200xf32, #tpu.memory_space<vmem>>, %arg4: memref<64x3xf32, #tpu.memory_space<vmem>>, %arg5: memref<128x64xf32, #tpu.memory_space<vmem>>, %arg6: memref<1x128x200xf32, #tpu.memory_space<vmem>>) attributes {dimension_semantics = [#tpu.dimension_semantics<parallel>], iteration_bounds = array<i64: 2>, scalar_prefetch = 0 : i64, scratch_operands = 0 : i64, tpu.core_type = #tpu.core_type<tc>, window_params = [{transform_indices = @transform_0, window_bounds = array<i64: 1, 3, 200>}, {pipeline_mode = #tpu.pipeline_mode<synchronous>, transform_indices = @transform_1, window_bounds = array<i64: 3, 200>}, {pipeline_mode = #tpu.pipeline_mode<synchronous>, transform_indices = @transform_2, window_bounds = array<i64: 3, 200>}, {pipeline_mode = #tpu.pipeline_mode<synchronous>, transform_indices = @transform_3, window_bounds = array<i64: 64, 3>}, {pipeline_mode = #tpu.pipeline_mode<synchronous>, transform_indices = @transform_4, window_bounds = array<i64: 128, 64>}, {transform_indices = @transform_5, window_bounds = array<i64: 1, 128, 200>}]} {
    %c0 = arith.constant 0 : index
    %c0_0 = arith.constant 0 : index
    %0 = vector.load %arg2[%c0, %c0_0] : memref<3x200xf32, #tpu.memory_space<vmem>>, vector<3x200xf32>
    %c0_1 = arith.constant 0 : index
    %c0_2 = arith.constant 0 : index
    %1 = vector.load %arg3[%c0_1, %c0_2] : memref<3x200xf32, #tpu.memory_space<vmem>>, vector<3x200xf32>
    %c0_3 = arith.constant 0 : index
    %c0_4 = arith.constant 0 : index
    %2 = vector.load %arg4[%c0_3, %c0_4] : memref<64x3xf32, #tpu.memory_space<vmem>>, vector<64x3xf32>
    %c0_5 = arith.constant 0 : index
    %c0_6 = arith.constant 0 : index
    %3 = vector.load %arg5[%c0_5, %c0_6] : memref<128x64xf32, #tpu.memory_space<vmem>>, vector<128x64xf32>
    %c0_7 = arith.constant 0 : index
    %c0_8 = arith.constant 0 : index
    %c0_9 = arith.constant 0 : index
    %4 = vector.load %arg1[%c0_7, %c0_8, %c0_9] : memref<1x3x200xf32, #tpu.memory_space<vmem>>, vector<1x3x200xf32>
    %5 = vector.shape_cast %4 : vector<1x3x200xf32> to vector<3x200xf32>
    %6 = arith.mulf %5, %0 : vector<3x200xf32>
    %7 = arith.addf %6, %1 : vector<3x200xf32>
    %8 = vector.extract_strided_slice %2 {offsets = [0, 0], sizes = [64, 1], strides = [1, 1]} : vector<64x3xf32> to vector<64x1xf32>
    %9 = vector.extract_strided_slice %7 {offsets = [0, 0], sizes = [1, 200], strides = [1, 1]} : vector<3x200xf32> to vector<1x200xf32>
    %10 = vector.broadcast %8 : vector<64x1xf32> to vector<64x200xf32>
    %11 = vector.broadcast %9 : vector<1x200xf32> to vector<64x200xf32>
    %12 = arith.mulf %10, %11 : vector<64x200xf32>
    %13 = vector.extract_strided_slice %2 {offsets = [0, 1], sizes = [64, 1], strides = [1, 1]} : vector<64x3xf32> to vector<64x1xf32>
    %14 = vector.extract_strided_slice %7 {offsets = [1, 0], sizes = [1, 200], strides = [1, 1]} : vector<3x200xf32> to vector<1x200xf32>
    %15 = vector.broadcast %13 : vector<64x1xf32> to vector<64x200xf32>
    %16 = vector.broadcast %14 : vector<1x200xf32> to vector<64x200xf32>
    %17 = arith.mulf %15, %16 : vector<64x200xf32>
    %18 = arith.addf %12, %17 : vector<64x200xf32>
    %19 = vector.extract_strided_slice %2 {offsets = [0, 2], sizes = [64, 1], strides = [1, 1]} : vector<64x3xf32> to vector<64x1xf32>
    %20 = vector.extract_strided_slice %7 {offsets = [2, 0], sizes = [1, 200], strides = [1, 1]} : vector<3x200xf32> to vector<1x200xf32>
    %21 = vector.broadcast %19 : vector<64x1xf32> to vector<64x200xf32>
    %22 = vector.broadcast %20 : vector<1x200xf32> to vector<64x200xf32>
    %23 = arith.mulf %21, %22 : vector<64x200xf32>
    %24 = arith.addf %18, %23 : vector<64x200xf32>
    %cst = arith.constant 0.000000e+00 : f32
    %25 = vector.broadcast %cst : f32 to vector<64x200xf32>
    %26 = arith.maximumf %24, %25 : vector<64x200xf32>
    %cst_10 = arith.constant dense<0.000000e+00> : vector<128x200xf32>
    %27 = tpu.matmul %3, %26, %cst_10 {dimension_numbers = #tpu.dot_dimension_numbers<[1], [0], [0], [1], [0, 0, 1, 1], [], []>} : vector<128x64xf32>, vector<64x200xf32>, vector<128x200xf32> -> vector<128x200xf32>
    %cst_11 = arith.constant 0.000000e+00 : f32
    %28 = vector.broadcast %cst_11 : f32 to vector<128x200xf32>
    %29 = arith.maximumf %27, %28 : vector<128x200xf32>
    %c0_12 = arith.constant 0 : index
    %c0_13 = arith.constant 0 : index
    %c0_14 = arith.constant 0 : index
    %30 = vector.load %arg6[%c0_12, %c0_13, %c0_14] : memref<1x128x200xf32, #tpu.memory_space<vmem>>, vector<1x128x200xf32>
    %31 = vector.shape_cast %30 : vector<1x128x200xf32> to vector<128x200xf32>
    %32 = vector.shape_cast %29 : vector<128x200xf32> to vector<1x128x200xf32>
    tpu.vector_store %arg6[%c0_12, %c0_13, %c0_14], %32 {strides = array<i32>} : memref<1x128x200xf32, #tpu.memory_space<vmem>>, vector<1x128x200xf32>,
    return
  }
  func.func @transform_0(%arg0: i32) -> (i32, i32, i32) {
    %c0_i32 = arith.constant 0 : i32
    %c0_i32_0 = arith.constant 0 : i32
    %c0_i32_1 = arith.constant 0 : i32
    return %arg0, %c0_i32, %c0_i32_0 : i32, i32, i32
  }
  func.func @transform_1(%arg0: i32) -> (i32, i32) {
    %c0_i32 = arith.constant 0 : i32
    %c0_i32_0 = arith.constant 0 : i32
    %c0_i32_1 = arith.constant 0 : i32
    return %c0_i32, %c0_i32_0 : i32, i32
  }
  func.func @transform_2(%arg0: i32) -> (i32, i32) {
    %c0_i32 = arith.constant 0 : i32
    %c0_i32_0 = arith.constant 0 : i32
    %c0_i32_1 = arith.constant 0 : i32
    return %c0_i32, %c0_i32_0 : i32, i32
  }
  func.func @transform_3(%arg0: i32) -> (i32, i32) {
    %c0_i32 = arith.constant 0 : i32
    %c0_i32_0 = arith.constant 0 : i32
    %c0_i32_1 = arith.constant 0 : i32
    return %c0_i32, %c0_i32_0 : i32, i32
  }
  func.func @transform_4(%arg0: i32) -> (i32, i32) {
    %c0_i32 = arith.constant 0 : i32
    %c0_i32_0 = arith.constant 0 : i32
    %c0_i32_1 = arith.constant 0 : i32
    return %c0_i32, %c0_i32_0 : i32, i32
  }
  func.func @transform_5(%arg0: i32) -> (i32, i32, i32) {
    %c0_i32 = arith.constant 0 : i32
    %c0_i32_0 = arith.constant 0 : i32
    %c0_i32_1 = arith.constant 0 : i32
    return %arg0, %c0_i32, %c0_i32_0 : i32, i32, i32
  }
}

</mosaic_0001>

<bundles_post_ra>
// kernel: tpu_custom_call.1
= control target key start
LH: loop header
LB: loop body
LE: loop exit
PB: predicated region body
PF: predicated region fallthrough
CT: control target
= control target key end

     0   :  { %s959_s18 = smov 0   ;;  %s1212_s0 = inlined_call_operand.vmem [shape: f32[2,3,200], index: 0, kind: input, shape index: {}]   ;;  %s1213_s1 = inlined_call_operand.vmem [shape: f32[3,200], index: 1, kind: input, shape index: {}]   ;;  %s1214_s2 = inlined_call_operand.vmem [shape: f32[3,200], index: 2, kind: input, shape index: {}]   ;;  %s1215_s3 = inlined_call_operand.vmem [shape: f32[64,3], index: 3, kind: input, shape index: {}]   ;;  %s1216_s4 = inlined_call_operand.vmem [shape: f32[128,64], index: 4, kind: input, shape index: {}]   ;;  %s1217_s5 = inlined_call_operand.vmem [shape: f32[2,128,200], index: 5, kind: output, shape index: {}]  }
   0x1 LB: > { %s839_s19 = sadd.s32 4294967295, %s923_s18   ;;  %p843_p0 = scmp.ge.s32.totalorder %s923_s18, 1  ;;  %s923_s18 = sphi %s959_s18, %s15_s18  }
   0x2   : > { %p187_p1 = scmp.lt.s32.totalorder %s923_s18, 3 }
   0x4   : > { %p188_p2 = pnand %p843_p0, %p187_p1 }
   0x5   : > { %v227_v0 = vld [vmem:[%s1215_s3] sm:$0xff] (!%p188_p2)  ;;  %v925_v1 = vmov (!%p188_p2), 1   ;;  %v926_v2 = vmov (!%p188_p2), 0   ;;  %v228_v3 = vld [vmem:[%s1215_s3 + $0x8] sm:$0xff] (!%p188_p2)  ;;  %v230_v4 = vld [vmem:[%s1215_s3 + $0x18] sm:$0xff] (!%p188_p2)  ;;  %v927_v5 = vmov (!%p188_p2), 2   ;;  %v295_v12 = vlaneseq (!%p188_p2) }
   0x6   : > { %191 = sbr.rel (%p188_p2) target bundleno = 457 (0x1c9), region = 40  ;;  %905 = vset.pattern.permute.xlu1 (!%p188_p2), %v925_v1  ;;  %904 = vset.pattern.permute.xlu0 (!%p188_p2), %v926_v2  ;;  %v232_v6 = vld [vmem:[%s1215_s3 + $0x28] sm:$0xff] (!%p188_p2)  ;;  %v229_v7 = vld [vmem:[%s1215_s3 + $0x10] sm:$0xff] (!%p188_p2)  ;;  %v234_v8 = vld [vmem:[%s1215_s3 + $0x38] sm:$0xff] (!%p188_p2)  ;;  %v928_v11 = vmov (!%p188_p2), 0.0   ;;  %p215_p3 = scmp.lt.s32.totalorder (!%p188_p2), %s839_s19, 1 }
   0x7   : > { %330 = vperm.xlu1 (!%p188_p2), %905, %v227_v0   ;;  %256 = vperm.xlu0 (!%p188_p2), %904, %v227_v0   ;;  %v231_v9 = vld [vmem:[%s1215_s3 + $0x20] sm:$0xff] (!%p188_p2)  ;;  %v233_v10 = vld [vmem:[%s1215_s3 + $0x30] sm:$0xff] (!%p188_p2)  ;;  %v296_v15 = vshrl.u32 (!%p188_p2), %v295_v12, 7  ;;  %vm509_vm0 = vcmask (!%p188_p2), 523264   ;;  %vm752_vm1 = vcmask (!%p188_p2), 588800  }
   0x8   : > { %622 = vmatprep.mubr.f32.mxu0 (!%p188_p2), %v928_v11  ;;  %670 = vmatprep.mubr.f32.mxu1 (!%p188_p2), %v928_v11  ;;  %v225_v13 = vld [vmem:[%s1213_s1] sm:$0x77] (!%p188_p2) }
   0x9   : > { %v226_v19 = vld [vmem:[%s1214_s2] sm:$0x77] (!%p188_p2)  ;;  %v363_v20 = vsub.s32 (!%p188_p2), 1, %v296_v15  ;;  %v367_v21 = vsub.s32 (!%p188_p2), 5, %v296_v15  ;;  %v297_v23 = vsub.s32 (!%p188_p2), 0, %v296_v15  ;;  %v301_v24 = vsub.s32 (!%p188_p2), 4, %v296_v15 }
   0xa   : > { %v445_v27 = vsub.s32 (!%p188_p2), 2, %v296_v15  ;;  %v449_v28 = vsub.s32 (!%p188_p2), 6, %v296_v15 }
   0xb   : > { %334 = vperm.xlu1 (!%p188_p2), %905, %v228_v3   ;;  %261 = vperm.xlu0 (!%p188_p2), %904, %v228_v3  }
   0xd   : > { %s1219_s19 = smov (!%p215_p3, %s839_s19), 1 }
   0xe   : > { %s866_s11 = sshll.u32 %s1219_s19, 3  ;;  %s867_s30 = sshll.u32 %s1219_s19, 8 }
   0xf   : > { %906 = vset.pattern.permute.xlu1 %v927_v5  ;;  %271 = vperm.xlu0 %904, %v230_v4   ;;  %s219_s14 = scalar_lea.vmem %s1212_s0, %s866_s11  ;;  %s1159_s8 = scalar_lea.vmem %s1217_s5, %s867_s30 }
  0x10   : > { %416 = vperm.xlu1 %906, %v228_v3   ;;  %v251_v14 = vld [vmem:[%s219_s14] sm:$0x77] }
  0x11   : > { %v252_v17 = vmul.f32 %v251_v14, %v225_v13 }
  0x13   : > { %281 = vperm.xlu0 %904, %v232_v6   ;;  %v253_v22 = vadd.f32 %v252_v17, %v226_v19 }
  0x14   : > { %907 = vset.pattern.permute.xlu1 %v926_v2 }
  0x15   : > { %266 = vperm.xlu1 %907, %v229_v7   ;;  %v364_v29 = vrot.slane %v253_v22, %v363_v20  ;;  %v368_v30 = vrot.slane %v253_v22, %v367_v21  ;;  %v298_v31 = vrot.slane %v253_v22, %v297_v23  ;;  %v302_v32 = vrot.slane %v253_v22, %v301_v24 }
  0x16   : > { %v446_v35 = vrot.slane %v253_v22, %v445_v27  ;;  %v450_v36 = vrot.slane %v253_v22, %v449_v28 }
  0x17   : > { %291 = vperm.xlu0 %904, %v234_v8   ;;  %v1009_v37 = vrot.slane %v364_v29, %v363_v20  ;;  %v1011_v38 = vrot.slane %v368_v30, %v363_v20  ;;  %v1013_v39 = vrot.slane %v298_v31, %v297_v23  ;;  %v1015_v40 = vrot.slane %v302_v32, %v297_v23 }
  0x18   : > { %v1019_v43 = vrot.slane %v446_v35, %v445_v27  ;;  %v1021_v44 = vrot.slane %v450_v36, %v445_v27 }
  0x19   : > { %908 = vset.pattern.permute.xlu1 %v925_v1 }
  0x1a   : > { %338 = vperm.xlu1 %908, %v229_v7  }
  0x1b   : > { %914 = vset.pattern.permute.xlu0 %v927_v5 }
  0x1c   : > { %412 = vperm.xlu0 %914, %v227_v0  }
  0x1e   : > { %342 = vperm.xlu1 %908, %v230_v4  }
  0x20   : > { %420 = vperm.xlu0 %914, %v229_v7  }
  0x22   : > { %909 = vset.pattern.permute.xlu1 %v927_v5 }
  0x23   : > { %424 = vperm.xlu1 %909, %v230_v4  }
  0x24   : > { %428 = vperm.xlu0 %914, %v231_v9  }
  0x27   : > { %910 = vset.pattern.permute.xlu1 %v926_v2 }
  0x28   : > { %276 = vperm.xlu1 %910, %v231_v9   ;;  %436 = vperm.xlu0 %914, %v233_v10  }
  0x2c   : > { %911 = vset.pattern.permute.xlu1 %v925_v1 }
  0x2d   : > { %346 = vperm.xlu1 %911, %v231_v9  }
  0x31   : > { %350 = vperm.xlu1 %911, %v232_v6  }
  0x35   : > { %912 = vset.pattern.permute.xlu1 %v927_v5 }
  0x36   : > { %432 = vperm.xlu1 %912, %v232_v6  }
  0x3a   : > { %913 = vset.pattern.permute.xlu1 %v926_v2 }
  0x3b   : > { %286 = vperm.xlu1 %913, %v233_v10  }
  0x3f   : > { %915 = vset.pattern.permute.xlu1 %v925_v1 }
  0x40   : > { %354 = vperm.xlu1 %915, %v233_v10  }
  0x44   : > { %358 = vperm.xlu1 %915, %v234_v8  }
  0x48   : > { %916 = vset.pattern.permute.xlu1 %v927_v5 }
  0x49   : > { %440 = vperm.xlu1 %916, %v234_v8  }
  0x86   : > { %v331_v16 = vpop.permute.xlu1 %330  ;;  %v257_v18 = vpop.permute.xlu0 %256 }
  0x87   : > { %v379_v45 = vmul.f32 %v1009_v37, %v331_v16  ;;  %v380_v46 = vmul.f32 %v1011_v38, %v331_v16  ;;  %v313_v47 = vmul.f32 %v1013_v39, %v257_v18  ;;  %v314_v48 = vmul.f32 %v1015_v40, %v257_v18 }
  0x89   : > { %v395_v57 = vadd.f32 %v379_v45, %v313_v47  ;;  %v396_v58 = vadd.f32 %v380_v46, %v314_v48 }
  0x8a   : > { %v335_v25 = vpop.permute.xlu1 %334  ;;  %v262_v26 = vpop.permute.xlu0 %261 }
  0x8b   : > { %v381_v50 = vmul.f32 %v1009_v37, %v335_v25  ;;  %v382_v51 = vmul.f32 %v1011_v38, %v335_v25  ;;  %v315_v52 = vmul.f32 %v1013_v39, %v262_v26  ;;  %v316_v53 = vmul.f32 %v1015_v40, %v262_v26 }
  0x8d   : > { %v397_v59 = vadd.f32 %v381_v50, %v315_v52  ;;  %v398_v60 = vadd.f32 %v382_v51, %v316_v53 }
  0x8e   : > { %v272_v33 = vpop.permute.xlu0 %271 }
  0x8f   : > { %v417_v34 = vpop.permute.xlu1 %416  ;;  %v319_v61 = vmul.f32 %v1013_v39, %v272_v33  ;;  %v320_v62 = vmul.f32 %v1015_v40, %v272_v33 }
  0x90   : > { %v463_v54 = vmul.f32 %v1019_v43, %v417_v34  ;;  %v464_v55 = vmul.f32 %v1021_v44, %v417_v34 }
  0x92   : > { %v1017_v41 = vpop.permute.xlu0 %281  ;;  %v479_v4 = vadd.f32 %v463_v54, %v397_v59  ;;  %v480_v5 = vadd.f32 %v464_v55, %v398_v60 }
  0x94   : > { %v267_v42 = vpop.permute.xlu1 %266  ;;  %v496_v20 = vmax.f32 %v480_v5, 0.0  ;;  %v495_v22 = vmax.f32 %v479_v4, 0.0 }
  0x95   : > { %v317_v6 = vmul.f32 %v1013_v39, %v267_v42  ;;  %v318_v7 = vmul.f32 %v1015_v40, %v267_v42 }
  0x96   : > { %v1027_v49 = vpop.permute.xlu0 %291 }
  0x99   : > { %v339_v56 = vpop.permute.xlu1 %338 }
  0x9a   : > { %v383_v0 = vmul.f32 %v1009_v37, %v339_v56  ;;  %v384_v1 = vmul.f32 %v1011_v38, %v339_v56 }
  0x9b   : > { %v413_v63 = vpop.permute.xlu0 %412 }
  0x9c   : > { %v461_v2 = vmul.f32 %v1019_v43, %v413_v63  ;;  %v462_v3 = vmul.f32 %v1021_v44, %v413_v63  ;;  %v399_v15 = vadd.f32 %v383_v0, %v317_v6  ;;  %v400_v16 = vadd.f32 %v384_v1, %v318_v7 }
  0x9d   : > { %v343_v8 = vpop.permute.xlu1 %342  ;;  %v324_v63 = vmul.f32 %v1015_v40, %v1017_v41 }
  0x9e   : > { %v477_v9 = vadd.f32 %v461_v2, %v395_v57  ;;  %v478_v10 = vadd.f32 %v462_v3, %v396_v58  ;;  %v385_v12 = vmul.f32 %v1009_v37, %v343_v8  ;;  %v386_v13 = vmul.f32 %v1011_v38, %v343_v8 }
  0x9f   : > { %v421_v14 = vpop.permute.xlu0 %420 }
  0xa0   : > { %v465_v17 = vmul.f32 %v1019_v43, %v421_v14  ;;  %v466_v18 = vmul.f32 %v1021_v44, %v421_v14  ;;  %v494_v19 = vmax.f32 %v478_v10, 0.0  ;;  %v493_v21 = vmax.f32 %v477_v9, 0.0 }
  0xa1   : > { %v401_v23 = vadd.f32 %v385_v12, %v319_v61  ;;  %v402_v24 = vadd.f32 %v386_v13, %v320_v62  ;;  %v323_v62 = vmul.f32 %v1013_v39, %v1017_v41 }
  0xa2   : > { %v481_v25 = vadd.f32 %v465_v17, %v399_v15  ;;  %v482_v26 = vadd.f32 %v466_v18, %v400_v16  ;;  %v425_v27 = vpop.permute.xlu1 %424  ;;  %v868_v30 = vpack.c.bf16 %v496_v20, %v494_v19  ;;  %v870_v31 = vpack.c.bf16 %v495_v22, %v493_v21 }
  0xa3   : > { %v467_v28 = vmul.f32 %v1019_v43, %v425_v27  ;;  %v468_v29 = vmul.f32 %v1021_v44, %v425_v27  ;;  %v429_v52 = vpop.permute.xlu0 %428 }
  0xa4   : > { %869 = vmatprep.subr.bf16.mxu0 %v868_v30  ;;  %884 = vmatprep.subr.bf16.mxu1 %v868_v30  ;;  %v497_v34 = vmax.f32 %v481_v25, 0.0  ;;  %v498_v35 = vmax.f32 %v482_v26, 0.0  ;;  %v469_v58 = vmul.f32 %v1019_v43, %v429_v52  ;;  %v470_v59 = vmul.f32 %v1021_v44, %v429_v52  ;;  %v245_v52 = vld [vmem:[%s1216_s4 + $0x50] sm:$0xff] }
  0xa5   : > { %v483_v32 = vadd.f32 %v467_v28, %v401_v23  ;;  %v484_v33 = vadd.f32 %v468_v29, %v402_v24  ;;  %871 = vmatpush1.bf16.msra.mxu0 %v870_v31  ;;  %888 = vmatpush1.bf16.msra.mxu1 %v870_v31  ;;  %v327_v29 = vmul.f32 %v1013_v39, %v1027_v49 }
  0xa6   : > { %v328_v30 = vmul.f32 %v1015_v40, %v1027_v49  ;;  %v244_v49 = vld [vmem:[%s1216_s4 + $0x48] sm:$0xff] }
  0xa7   : > { %v499_v36 = vmax.f32 %v483_v32, 0.0  ;;  %v500_v42 = vmax.f32 %v484_v33, 0.0  ;;  %v277_v45 = vpop.permute.xlu1 %276  ;;  %v437_v21 = vpop.permute.xlu0 %436 }
  0xa8   : > { %v321_v53 = vmul.f32 %v1013_v39, %v277_v45  ;;  %v322_v54 = vmul.f32 %v1015_v40, %v277_v45  ;;  %v473_v27 = vmul.f32 %v1019_v43, %v437_v21  ;;  %v474_v28 = vmul.f32 %v1021_v44, %v437_v21 }
  0xa9   : > { %v872_v46 = vpack.c.bf16 %v500_v42, %v498_v35  ;;  %v874_v47 = vpack.c.bf16 %v499_v36, %v497_v34 }
  0xab   : > { %873 = vmatprep.subr.bf16.mxu0 %v872_v46  ;;  %885 = vmatprep.subr.bf16.mxu1 %v872_v46 }
  0xac   : > { %v347_v48 = vpop.permute.xlu1 %346  ;;  %875 = vmatpush1.bf16.msra.mxu0 %v874_v47  ;;  %889 = vmatpush1.bf16.msra.mxu1 %v874_v47 }
  0xad   : > { %v387_v50 = vmul.f32 %v1009_v37, %v347_v48  ;;  %v388_v51 = vmul.f32 %v1011_v38, %v347_v48 }
  0xaf   : > { %v403_v56 = vadd.f32 %v387_v50, %v321_v53  ;;  %v404_v57 = vadd.f32 %v388_v51, %v322_v54  ;;  %v237_v51 = vld [vmem:[%s1216_s4 + $0x10] sm:$0xff]  ;;  %v238_v53 = vld [vmem:[%s1216_s4 + $0x18] sm:$0xff] }
  0xb0   : > { %v351_v55 = vpop.permute.xlu1 %350  ;;  %v246_v54 = vld [vmem:[%s1216_s4 + $0x58] sm:$0xff] }
  0xb1   : > { %v389_v60 = vmul.f32 %v1009_v37, %v351_v55  ;;  %v390_v61 = vmul.f32 %v1011_v38, %v351_v55  ;;  %v485_v0 = vadd.f32 %v469_v58, %v403_v56  ;;  %v486_v1 = vadd.f32 %v470_v59, %v404_v57  ;;  %v239_v55 = vld [vmem:[%s1216_s4 + $0x20] sm:$0xff]  ;;  %v240_v57 = vld [vmem:[%s1216_s4 + $0x28] sm:$0xff]  ;;  %v241_v59 = vld [vmem:[%s1216_s4 + $0x30] sm:$0xff] }
  0xb2   : > { %v247_v56 = vld [vmem:[%s1216_s4 + $0x60] sm:$0xff]  ;;  %v248_v58 = vld [vmem:[%s1216_s4 + $0x68] sm:$0xff] }
  0xb3   : > { %v405_v3 = vadd.f32 %v389_v60, %v323_v62  ;;  %v406_v4 = vadd.f32 %v390_v61, %v324_v63  ;;  %v501_v9 = vmax.f32 %v485_v0, 0.0  ;;  %v502_v10 = vmax.f32 %v486_v1, 0.0  ;;  %v249_v60 = vld [vmem:[%s1216_s4 + $0x70] sm:$0xff]  ;;  %v242_v61 = vld [vmem:[%s1216_s4 + $0x38] sm:$0xff] }
  0xb4   : > { %v250_v62 = vld [vmem:[%s1216_s4 + $0x78] sm:$0xff] }
  0xb5   : > { %v433_v2 = vpop.permute.xlu1 %432 }
  0xb6   : > { %v471_v5 = vmul.f32 %v1019_v43, %v433_v2  ;;  %v472_v6 = vmul.f32 %v1021_v44, %v433_v2 }
  0xb8   : > { %v487_v7 = vadd.f32 %v471_v5, %v405_v3  ;;  %v488_v8 = vadd.f32 %v472_v6, %v406_v4 }
  0xba   : > { %v503_v12 = vmax.f32 %v487_v7, 0.0  ;;  %v504_v13 = vmax.f32 %v488_v8, 0.0  ;;  %v287_v14 = vpop.permute.xlu1 %286 }
  0xbb   : > { %v325_v19 = vmul.f32 %v1013_v39, %v287_v14  ;;  %v326_v20 = vmul.f32 %v1015_v40, %v287_v14  ;;  %v235_v40 = vld [vmem:[%s1216_s4] sm:$0xff] }
  0xbc   : > { %v876_v15 = vpack.c.bf16 %v504_v13, %v502_v10  ;;  %v878_v16 = vpack.c.bf16 %v503_v12, %v501_v9 }
  0xbe   : > { %877 = vmatprep.subr.bf16.mxu0 %v876_v15  ;;  %886 = vmatprep.subr.bf16.mxu1 %v876_v15 }
  0xbf   : > { %v355_v41 = vpop.permute.xlu1 %354  ;;  %879 = vmatpush1.bf16.msra.mxu0 %v878_v16  ;;  %890 = vmatpush1.bf16.msra.mxu1 %v878_v16 }
  0xc0   : > { %v391_v17 = vmul.f32 %v1009_v37, %v355_v41  ;;  %v392_v18 = vmul.f32 %v1011_v38, %v355_v41 }
  0xc2   : > { %v407_v23 = vadd.f32 %v391_v17, %v325_v19  ;;  %v408_v24 = vadd.f32 %v392_v18, %v326_v20 }
  0xc3   : > { %v359_v22 = vpop.permute.xlu1 %358 }
  0xc4   : > { %v393_v25 = vmul.f32 %v1009_v37, %v359_v22  ;;  %v394_v26 = vmul.f32 %v1011_v38, %v359_v22  ;;  %v489_v31 = vadd.f32 %v473_v27, %v407_v23  ;;  %v490_v32 = vadd.f32 %v474_v28, %v408_v24 }
  0xc6   : > { %v409_v34 = vadd.f32 %v393_v25, %v327_v29  ;;  %v410_v35 = vadd.f32 %v394_v26, %v328_v30  ;;  %v506_v47 = vmax.f32 %v490_v32, 0.0  ;;  %v505_v48 = vmax.f32 %v489_v31, 0.0 }
  0xc8   : > { %v441_v33 = vpop.permute.xlu1 %440 }
  0xc9   : > { %v475_v36 = vmul.f32 %v1019_v43, %v441_v33  ;;  %v476_v37 = vmul.f32 %v1021_v44, %v441_v33  ;;  %v243_v43 = vld [vmem:[%s1216_s4 + $0x40] sm:$0xff]  ;;  %v236_v44 = vld [vmem:[%s1216_s4 + $0x8] sm:$0xff] }
  0xcb   : > { %v491_v38 = vadd.f32 %v475_v36, %v409_v34  ;;  %v492_v42 = vadd.f32 %v476_v37, %v410_v35 }
  0xcd   : > { %v507_v45 = vmax.f32 %v491_v38, 0.0  ;;  %v508_v46 = vmax.f32 %v492_v42, 0.0 }
  0xcf   : > { %v880_v50 = vpack.c.bf16 %v508_v46, %v506_v47  ;;  %v882_v39 = vpack.c.bf16 %v507_v45, %v505_v48 }
  0xd1   : > { %881 = vmatprep.subr.bf16.mxu0 %v880_v50  ;;  %887 = vmatprep.subr.bf16.mxu1 %v880_v50 }
  0xd2   : > { %883 = vmatpush1.bf16.msra.mxu0 %v882_v39  ;;  %891 = vmatpush1.bf16.msra.mxu1 %v882_v39 }
  0xd5   : > { %848 = vmatmul.mubr.msk.f32.vlgmr.msra.gmra.mrb[0].mxu0 %vm509_vm0, %v235_v40  ;;  %856 = vmatmul.mubr.msk.f32.vlgmr.msra.gmra.mrb[0].mxu1 %vm509_vm0, %v243_v43 }
  0xd6   : > { %628 = vmatprep.mubr.f32.mxu0 %v928_v11  ;;  %676 = vmatprep.mubr.f32.mxu1 %v928_v11 }
  0xd9   : > { %849 = vmatmul.mubr.msk.f32.gmra.mrb[2].mxu0 %vm509_vm0, %v236_v44  ;;  %857 = vmatmul.mubr.msk.f32.gmra.mrb[2].mxu1 %vm509_vm0, %v244_v49 }
  0xda   : > { %634 = vmatprep.mubr.f32.mxu0 %v928_v11  ;;  %682 = vmatprep.mubr.f32.mxu1 %v928_v11 }
  0xdd   : > { %850 = vmatmul.mubr.msk.f32.gmra.mrb[4].mxu0 %vm509_vm0, %v237_v51  ;;  %858 = vmatmul.mubr.msk.f32.gmra.mrb[4].mxu1 %vm509_vm0, %v245_v52 }
  0xde   : > { %640 = vmatprep.mubr.f32.mxu0 %v928_v11  ;;  %688 = vmatprep.mubr.f32.mxu1 %v928_v11 }
  0xe1   : > { %851 = vmatmul.mubr.msk.f32.gmra.mrb[6].mxu0 %vm509_vm0, %v238_v53  ;;  %859 = vmatmul.mubr.msk.f32.gmra.mrb[6].mxu1 %vm509_vm0, %v246_v54 }
  0xe2   : > { %646 = vmatprep.mubr.f32.mxu0 %v928_v11  ;;  %694 = vmatprep.mubr.f32.mxu1 %v928_v11 }
  0xe5   : > { %852 = vmatmul.mubr.msk.f32.gmra.mrb[8].mxu0 %vm509_vm0, %v239_v55  ;;  %860 = vmatmul.mubr.msk.f32.gmra.mrb[8].mxu1 %vm509_vm0, %v247_v56 }
  0xe6   : > { %652 = vmatprep.mubr.f32.mxu0 %v928_v11  ;;  %700 = vmatprep.mubr.f32.mxu1 %v928_v11 }
  0xe9   : > { %853 = vmatmul.mubr.msk.f32.gmra.mrb[10].mxu0 %vm509_vm0, %v240_v57  ;;  %861 = vmatmul.mubr.msk.f32.gmra.mrb[10].mxu1 %vm509_vm0, %v248_v58 }
  0xea   : > { %658 = vmatprep.mubr.f32.mxu0 %v928_v11  ;;  %706 = vmatprep.mubr.f32.mxu1 %v928_v11 }
  0xed   : > { %854 = vmatmul.mubr.msk.f32.gmra.mrb[12].mxu0 %vm509_vm0, %v241_v59  ;;  %862 = vmatmul.mubr.msk.f32.gmra.mrb[12].mxu1 %vm509_vm0, %v249_v60 }
  0xee   : > { %664 = vmatprep.mubr.f32.mxu0 %v928_v11  ;;  %712 = vmatprep.mubr.f32.mxu1 %v928_v11 }
  0xf1   : > { %855 = vmatmul.mubr.msk.f32.gmra.mrb[14].mxu0 %vm509_vm0, %v242_v61  ;;  %863 = vmatmul.mubr.msk.f32.gmra.mrb[14].mxu1 %vm509_vm0, %v250_v62 }
 0x1a8   : > { %v624_v11 = vpop.f32.mrb[0].mxu0  ;;  %v672_v63 = vpop.f32.mrb[0].mxu1 }
 0x1a9   : > { %v719_v0 = vmax.f32 %v624_v11, 0.0  ;;  %v735_v1 = vmax.f32 %v672_v63, 0.0  ;;  %v626_v2 = vpop.f32.mrb[1].mxu0  ;;  %v674_v3 = vpop.f32.mrb[1].mxu1 }
 0x1aa   : > { %v720_v4 = vmax.f32 %v626_v2, 0.0  ;;  %v736_v5 = vmax.f32 %v674_v3, 0.0 }
 0x1ab   : > { %751 = vst [vmem:[%s1159_s8] sm:$0xff] %v719_v0  ;;  %768 = vst [vmem:[%s1159_s8 + $0x80] sm:$0xff] %v735_v1 }
 0x1ac   : > { %753 = vst.msk [vmem:[%s1159_s8 + $0x8] sm:$0xff] %vm752_vm1, %v720_v4  ;;  %769 = vst.msk [vmem:[%s1159_s8 + $0x88] sm:$0xff] %vm752_vm1, %v736_v5  ;;  %v630_v6 = vpop.f32.mrb[2].mxu0  ;;  %v678_v7 = vpop.f32.mrb[2].mxu1 }
 0x1ad   : > { %v721_v8 = vmax.f32 %v630_v6, 0.0  ;;  %v737_v9 = vmax.f32 %v678_v7, 0.0  ;;  %v632_v10 = vpop.f32.mrb[3].mxu0  ;;  %v680_v12 = vpop.f32.mrb[3].mxu1 }
 0x1ae   : > { %v722_v13 = vmax.f32 %v632_v10, 0.0  ;;  %v738_v14 = vmax.f32 %v680_v12, 0.0 }
 0x1af   : > { %754 = vst [vmem:[%s1159_s8 + $0x10] sm:$0xff] %v721_v8  ;;  %770 = vst [vmem:[%s1159_s8 + $0x90] sm:$0xff] %v737_v9 }
 0x1b0   : > { %755 = vst.msk [vmem:[%s1159_s8 + $0x18] sm:$0xff] %vm752_vm1, %v722_v13  ;;  %771 = vst.msk [vmem:[%s1159_s8 + $0x98] sm:$0xff] %vm752_vm1, %v738_v14  ;;  %v636_v15 = vpop.f32.mrb[4].mxu0  ;;  %v684_v16 = vpop.f32.mrb[4].mxu1 }
 0x1b1   : > { %v723_v41 = vmax.f32 %v636_v15, 0.0  ;;  %v739_v17 = vmax.f32 %v684_v16, 0.0  ;;  %v638_v18 = vpop.f32.mrb[5].mxu0  ;;  %v686_v19 = vpop.f32.mrb[5].mxu1 }
 0x1b2   : > { %v724_v20 = vmax.f32 %v638_v18, 0.0  ;;  %v740_v21 = vmax.f32 %v686_v19, 0.0 }
 0x1b3   : > { %756 = vst [vmem:[%s1159_s8 + $0x20] sm:$0xff] %v723_v41  ;;  %772 = vst [vmem:[%s1159_s8 + $0xa0] sm:$0xff] %v739_v17 }
 0x1b4   : > { %757 = vst.msk [vmem:[%s1159_s8 + $0x28] sm:$0xff] %vm752_vm1, %v724_v20  ;;  %773 = vst.msk [vmem:[%s1159_s8 + $0xa8] sm:$0xff] %vm752_vm1, %v740_v21  ;;  %v642_v22 = vpop.f32.mrb[6].mxu0  ;;  %v690_v23 = vpop.f32.mrb[6].mxu1 }
 0x1b5   : > { %v725_v24 = vmax.f32 %v642_v22, 0.0  ;;  %v741_v25 = vmax.f32 %v690_v23, 0.0  ;;  %v644_v26 = vpop.f32.mrb[7].mxu0  ;;  %v692_v27 = vpop.f32.mrb[7].mxu1 }
 0x1b6   : > { %v726_v28 = vmax.f32 %v644_v26, 0.0  ;;  %v742_v29 = vmax.f32 %v692_v27, 0.0 }
 0x1b7   : > { %758 = vst [vmem:[%s1159_s8 + $0x30] sm:$0xff] %v725_v24  ;;  %774 = vst [vmem:[%s1159_s8 + $0xb0] sm:$0xff] %v741_v25 }
 0x1b8   : > { %759 = vst.msk [vmem:[%s1159_s8 + $0x38] sm:$0xff] %vm752_vm1, %v726_v28  ;;  %775 = vst.msk [vmem:[%s1159_s8 + $0xb8] sm:$0xff] %vm752_vm1, %v742_v29  ;;  %v648_v30 = vpop.f32.mrb[8].mxu0  ;;  %v696_v31 = vpop.f32.mrb[8].mxu1 }
 0x1b9   : > { %v727_v32 = vmax.f32 %v648_v30, 0.0  ;;  %v743_v33 = vmax.f32 %v696_v31, 0.0  ;;  %v650_v34 = vpop.f32.mrb[9].mxu0  ;;  %v698_v35 = vpop.f32.mrb[9].mxu1 }
 0x1ba   : > { %v728_v36 = vmax.f32 %v650_v34, 0.0  ;;  %v744_v37 = vmax.f32 %v698_v35, 0.0 }
 0x1bb   : > { %760 = vst [vmem:[%s1159_s8 + $0x40] sm:$0xff] %v727_v32  ;;  %776 = vst [vmem:[%s1159_s8 + $0xc0] sm:$0xff] %v743_v33 }
 0x1bc   : > { %761 = vst.msk [vmem:[%s1159_s8 + $0x48] sm:$0xff] %vm752_vm1, %v728_v36  ;;  %777 = vst.msk [vmem:[%s1159_s8 + $0xc8] sm:$0xff] %vm752_vm1, %v744_v37  ;;  %v654_v38 = vpop.f32.mrb[10].mxu0  ;;  %v702_v42 = vpop.f32.mrb[10].mxu1 }
 0x1bd   : > { %v729_v45 = vmax.f32 %v654_v38, 0.0  ;;  %v745_v46 = vmax.f32 %v702_v42, 0.0  ;;  %v656_v47 = vpop.f32.mrb[11].mxu0  ;;  %v704_v48 = vpop.f32.mrb[11].mxu1 }
 0x1be   : > { %v730_v50 = vmax.f32 %v656_v47, 0.0  ;;  %v746_v39 = vmax.f32 %v704_v48, 0.0 }
 0x1bf   : > { %762 = vst [vmem:[%s1159_s8 + $0x50] sm:$0xff] %v729_v45  ;;  %778 = vst [vmem:[%s1159_s8 + $0xd0] sm:$0xff] %v745_v46 }
 0x1c0   : > { %763 = vst.msk [vmem:[%s1159_s8 + $0x58] sm:$0xff] %vm752_vm1, %v730_v50  ;;  %779 = vst.msk [vmem:[%s1159_s8 + $0xd8] sm:$0xff] %vm752_vm1, %v746_v39  ;;  %v660_v40 = vpop.f32.mrb[12].mxu0  ;;  %v708_v43 = vpop.f32.mrb[12].mxu1 }
 0x1c1   : > { %v731_v44 = vmax.f32 %v660_v40, 0.0  ;;  %v747_v49 = vmax.f32 %v708_v43, 0.0  ;;  %v662_v51 = vpop.f32.mrb[13].mxu0  ;;  %v710_v52 = vpop.f32.mrb[13].mxu1 }
 0x1c2   : > { %v732_v53 = vmax.f32 %v662_v51, 0.0  ;;  %v748_v54 = vmax.f32 %v710_v52, 0.0 }
 0x1c3   : > { %764 = vst [vmem:[%s1159_s8 + $0x60] sm:$0xff] %v731_v44  ;;  %780 = vst [vmem:[%s1159_s8 + $0xe0] sm:$0xff] %v747_v49 }
 0x1c4   : > { %765 = vst.msk [vmem:[%s1159_s8 + $0x68] sm:$0xff] %vm752_vm1, %v732_v53  ;;  %781 = vst.msk [vmem:[%s1159_s8 + $0xe8] sm:$0xff] %vm752_vm1, %v748_v54  ;;  %v666_v55 = vpop.f32.mrb[14].mxu0  ;;  %v714_v56 = vpop.f32.mrb[14].mxu1 }
 0x1c5   : > { %v733_v57 = vmax.f32 %v666_v55, 0.0  ;;  %v749_v58 = vmax.f32 %v714_v56, 0.0  ;;  %v668_v59 = vpop.f32.mrb[15].mxu0  ;;  %v716_v60 = vpop.f32.mrb[15].mxu1 }
 0x1c6   : > { %v734_v61 = vmax.f32 %v668_v59, 0.0  ;;  %v750_v62 = vmax.f32 %v716_v60, 0.0 }
 0x1c7   : > { %766 = vst [vmem:[%s1159_s8 + $0x70] sm:$0xff] %v733_v57  ;;  %782 = vst [vmem:[%s1159_s8 + $0xf0] sm:$0xff] %v749_v58 }
 0x1c8   : > { %767 = vst.msk [vmem:[%s1159_s8 + $0x78] sm:$0xff] %vm752_vm1, %v734_v61  ;;  %783 = vst.msk [vmem:[%s1159_s8 + $0xf8] sm:$0xff] %vm752_vm1, %v750_v62 }
 0x1c9 PF: > { %s15_s18 = sadd.s32 1, %s923_s18  }
 0x1ca   : > { %p12_p4 = scmp.ge.s32.totalorder %s15_s18, 4  }
 0x1cc   :  { %14 = sbr.rel (!%p12_p4) target bundleno = 1 (0x1), region = 70 }

</bundles_post_ra>
